<compile_context>
chip_gen: v5e
topology: v5e:2x2
jax: 0.10.0
libtpu: 0.0.40
codegen_flags: <defaults>
</compile_context>

<pallas_src>
import math
from functools import partial

import jax
import jax.numpy as jnp
from jax.experimental import pallas as pl
from jax.experimental.pallas import tpu as pltpu


def _encoder_stack_kernel(num_heads,
                          x_ref, wqkv_ref, wow1_ref, w2_ref, vec_ref,
                          o_ref, xs_ref):
    """One grid step == one pre-LN encoder layer. xs_ref keeps x resident in VMEM."""
    eps = 1e-5
    layer = pl.program_id(0)
    nlayers = pl.num_programs(0)

    @pl.when(layer == 0)
    def _init():
        xs_ref[...] = x_ref[...].astype(jnp.float32)

    x = xs_ref[...]                          # [S, D] f32, carried across layers
    D = x.shape[-1]
    H = w2_ref.shape[0]
    dh = D // num_heads

    wqkv = wqkv_ref[...]                     # [D, 3D]  (Q columns pre-scaled by 1/sqrt(dh))
    wow1 = wow1_ref[...]                     # [D, D+H] = [Wo^T | W1^T]
    wo = wow1[:, :D]
    w1 = wow1[:, D:D + H]
    w2 = w2_ref[...]                         # [H, D]
    vec = vec_ref[...]                       # [8, VW] packed bias / LN slab
    bqkv = vec[0:1, :3 * D]
    bo, b1, b2 = vec[1:2, :D], vec[2:3, :H], vec[3:4, :D]
    g1, be1 = vec[4:5, :D], vec[5:6, :D]
    g2, be2 = vec[6:7, :D], vec[7:8, :D]

    # ---- pre-LayerNorm 1 ----
    mu = jnp.mean(x, axis=-1, keepdims=True)
    var = jnp.mean((x - mu) ** 2, axis=-1, keepdims=True)      # biased var (PyTorch LN)
    xn = (x - mu) * jax.lax.rsqrt(var + eps) * g1 + be1

    # ---- multi-head self-attention ----
    qkv = jnp.dot(xn, wqkv, preferred_element_type=jnp.float32) + bqkv
    q = qkv[:, 0 * D:1 * D]                  # already scaled by 1/sqrt(dh)
    k = qkv[:, 1 * D:2 * D]
    v = qkv[:, 2 * D:3 * D]

    heads = []
    for h in range(num_heads):               # static (unrolled) loop over heads
        sl = slice(h * dh, (h + 1) * dh)
        s = jax.lax.dot_general(q[:, sl], k[:, sl], (((1,), (1,)), ((), ())),
                                preferred_element_type=jnp.float32)   # [S, S]
        s = s - jnp.max(s, axis=-1, keepdims=True)
        p = jnp.exp(s)
        p = p * pl.reciprocal(jnp.sum(p, axis=-1, keepdims=True), approx=True)
        heads.append(jnp.dot(p, v[:, sl], preferred_element_type=jnp.float32))
    head_cat = jnp.concatenate(heads, axis=-1)                        # [S, D]
    attn = jnp.dot(head_cat, wo, preferred_element_type=jnp.float32) + bo
    x = x + attn                             # dropout: identity (eval mode)

    # ---- pre-LayerNorm 2 + feed-forward ----
    mu2 = jnp.mean(x, axis=-1, keepdims=True)
    var2 = jnp.mean((x - mu2) ** 2, axis=-1, keepdims=True)
    xn2 = (x - mu2) * jax.lax.rsqrt(var2 + eps) * g2 + be2
    h1 = jnp.maximum(jnp.dot(xn2, w1, preferred_element_type=jnp.float32) + b1, 0.0)
    ff = jnp.dot(h1, w2, preferred_element_type=jnp.float32) + b2
    x = x + ff                               # dropout: identity (eval mode)

    xs_ref[...] = x

    @pl.when(layer == nlayers - 1)
    def _store():
        o_ref[...] = x.astype(o_ref.dtype)


@partial(jax.jit, static_argnames=("num_heads",))
def transformer_encoder(particles_x, root_x, packed, num_heads):
    """forward(): x = cat([particles_x, root_x], 0).unsqueeze(0); o = encoder(x)[0]."""
    wqkv_s, wow1_s, w2_s, vec_s = packed
    L = wqkv_s.shape[0]
    x = jnp.concatenate([particles_x, root_x], axis=0)       # [S, D], S = n_particles + 1
    S, D = x.shape
    return pl.pallas_call(
        partial(_encoder_stack_kernel, num_heads),
        out_shape=jax.ShapeDtypeStruct((S, D), x.dtype),
        grid=(L,),
        in_specs=[
            pl.BlockSpec((S, D), lambda l: (0, 0)),                       # x (read at l==0)
            pl.BlockSpec((None,) + wqkv_s.shape[1:], lambda l: (l, 0, 0)),  # [D, 3D]
            pl.BlockSpec((None,) + wow1_s.shape[1:], lambda l: (l, 0, 0)),  # [D, D+H]
            pl.BlockSpec((None,) + w2_s.shape[1:], lambda l: (l, 0, 0)),    # [H, D]
            pl.BlockSpec((None,) + vec_s.shape[1:], lambda l: (l, 0, 0)),   # [8, VW]
        ],
        out_specs=pl.BlockSpec((S, D), lambda l: (0, 0)),
        scratch_shapes=[pltpu.VMEM((S, D), jnp.float32)],      # x resident across layers
        compiler_params=pltpu.CompilerParams(
            dimension_semantics=("arbitrary",)),               # sequential over layers
    )(x, wqkv_s, wow1_s, w2_s, vec_s)


def init_layer_params(key, D, H):
    """Deterministic synthetic parameters, PyTorch nn.TransformerEncoderLayer shapes."""
    ks = jax.random.split(key, 6)
    s = 0.02
    return dict(
        wqkv=jax.random.normal(ks[0], (3 * D, D), jnp.float32) * s,   # in_proj_weight
        bqkv=jax.random.normal(ks[4], (3 * D,), jnp.float32) * s,     # in_proj_bias
        wo=jax.random.normal(ks[1], (D, D), jnp.float32) * s,         # out_proj.weight
        bo=jnp.zeros((D,), jnp.float32),
        w1=jax.random.normal(ks[2], (H, D), jnp.float32) * s,         # linear1.weight
        b1=jax.random.normal(ks[5], (H,), jnp.float32) * s,
        w2=jax.random.normal(ks[3], (D, H), jnp.float32) * s,         # linear2.weight
        b2=jnp.zeros((D,), jnp.float32),
        g1=jnp.ones((D,), jnp.float32), be1=jnp.zeros((D,), jnp.float32),
        g2=jnp.ones((D,), jnp.float32), be2=jnp.zeros((D,), jnp.float32),
    )


def pack_params(layer_params, D, H, num_heads):
    """Stack per-layer weights along L, pre-transpose, pre-scale Q, pack small vectors."""
    dh = D // num_heads
    scale = 1.0 / math.sqrt(dh)
    VW = max(3 * D, H)

    def pad_row(v):
        return jnp.pad(v, (0, VW - v.shape[0]))

    wqkv_s, wow1_s, w2_s, vec_s = [], [], [], []
    for p in layer_params:
        wqkv_t = p["wqkv"].T                                            # [D, 3D]
        wqkv_t = jnp.concatenate([wqkv_t[:, :D] * scale, wqkv_t[:, D:]], axis=1)
        wqkv_s.append(wqkv_t)
        wow1_s.append(jnp.concatenate([p["wo"].T, p["w1"].T], axis=1))  # [D, D+H]
        w2_s.append(p["w2"].T)                                          # [H, D]
        bqkv = jnp.concatenate([p["bqkv"][:D] * scale, p["bqkv"][D:]])
        vec_s.append(jnp.stack([pad_row(bqkv),
                                pad_row(p["bo"]), pad_row(p["b1"]), pad_row(p["b2"]),
                                pad_row(p["g1"]), pad_row(p["be1"]),
                                pad_row(p["g2"]), pad_row(p["be2"])], axis=0))  # [8, VW]
    return (jnp.stack(wqkv_s), jnp.stack(wow1_s), jnp.stack(w2_s), jnp.stack(vec_s))


def _ref_layer(x, p, num_heads):
    """Pure-JAX reference of one pre-LN encoder layer (eval mode)."""
    D = x.shape[-1]
    dh = D // num_heads

    def ln(y, g, b):
        mu = y.mean(-1, keepdims=True)
        var = ((y - mu) ** 2).mean(-1, keepdims=True)
        return (y - mu) / jnp.sqrt(var + 1e-5) * g + b

    xn = ln(x, p["g1"], p["be1"])
    qkv = xn @ p["wqkv"].T + p["bqkv"]
    q, k, v = qkv[:, :D], qkv[:, D:2 * D], qkv[:, 2 * D:]
    outs = []
    for h in range(num_heads):
        sl = slice(h * dh, (h + 1) * dh)
        s = (q[:, sl] @ k[:, sl].T) / math.sqrt(dh)
        a = jax.nn.softmax(s, axis=-1)
        outs.append(a @ v[:, sl])
    attn = jnp.concatenate(outs, -1) @ p["wo"].T + p["bo"]
    x = x + attn
    xn2 = ln(x, p["g2"], p["be2"])
    ff = jnp.maximum(xn2 @ p["w1"].T + p["b1"], 0.0) @ p["w2"].T + p["b2"]
    return x + ff


if __name__ == "__main__":
    # small shapes: input_size=32, hidden_size=64, heads=4, num_layers=2, n_particles=7
    D, H, NUM_HEADS, NUM_LAYERS = 32, 64, 4, 2
    N_PARTICLES = 7

    key = jax.random.PRNGKey(0)
    keys = jax.random.split(key, 2 + NUM_LAYERS)
    kp, kr, kl = keys[0], keys[1], keys[2:]

    particles_x = jax.random.normal(kp, (N_PARTICLES, D), jnp.float32)
    root_x = jax.random.normal(kr, (1, D), jnp.float32)
    layer_params = [init_layer_params(k, D, H) for k in kl]
    packed = pack_params(layer_params, D, H, NUM_HEADS)

    out = transformer_encoder(particles_x, root_x, packed, NUM_HEADS)
    out = jax.block_until_ready(out)

    # correctness check against pure-JAX reference (tolerance covers the EUP
    # approximate reciprocal used for the softmax denominator in the kernel)
    x_chk = jnp.concatenate([particles_x, root_x], axis=0)
    for p in layer_params:
        x_chk = _ref_layer(x_chk, p, NUM_HEADS)

    assert out.shape == (N_PARTICLES + 1, D)
    max_err = float(jnp.max(jnp.abs(out - x_chk)))
    assert jnp.allclose(out, x_chk, rtol=2e-3, atol=2e-3), \
        f"kernel mismatch vs reference (max abs err {max_err})"
    print("KERNEL_OK")
</pallas_src>

<mosaic_0001>
module attributes {stable_mosaic.version = 11 : i64} {
  func.func @_encoder_stack_kernel(%arg0: i32, %arg1: memref<8x32xf32, #tpu.memory_space<vmem>>, %arg2: memref<1x32x96xf32, #tpu.memory_space<vmem>>, %arg3: memref<1x32x96xf32, #tpu.memory_space<vmem>>, %arg4: memref<1x64x32xf32, #tpu.memory_space<vmem>>, %arg5: memref<1x8x96xf32, #tpu.memory_space<vmem>>, %arg6: memref<8x32xf32, #tpu.memory_space<vmem>>, %arg7: memref<8x32xf32, #tpu.memory_space<vmem>>) attributes {dimension_semantics = [#tpu.dimension_semantics<arbitrary>], iteration_bounds = array<i64: 2>, scalar_prefetch = 0 : i64, scratch_operands = 1 : i64, tpu.core_type = #tpu.core_type<tc>, window_params = [{pipeline_mode = #tpu.pipeline_mode<synchronous>, transform_indices = @transform_0, window_bounds = array<i64: 8, 32>}, {transform_indices = @transform_1, window_bounds = array<i64: 1, 32, 96>}, {transform_indices = @transform_2, window_bounds = array<i64: 1, 32, 96>}, {transform_indices = @transform_3, window_bounds = array<i64: 1, 64, 32>}, {transform_indices = @transform_4, window_bounds = array<i64: 1, 8, 96>}, {pipeline_mode = #tpu.pipeline_mode<synchronous>, transform_indices = @transform_5, window_bounds = array<i64: 8, 32>}]} {
    %c0_i32 = arith.constant 0 : i32
    %0 = arith.cmpi eq, %arg0, %c0_i32 : i32
    %1 = arith.extui %0 : i1 to i32
    %c0_i32_0 = arith.constant 0 : i32
    %2 = arith.cmpi ne, %1, %c0_i32_0 : i32
    scf.if %2 {
      %c0_47 = arith.constant 0 : index
      %c0_48 = arith.constant 0 : index
      %150 = vector.load %arg1[%c0_47, %c0_48] : memref<8x32xf32, #tpu.memory_space<vmem>>, vector<8x32xf32>
      %c0_49 = arith.constant 0 : index
      %c0_50 = arith.constant 0 : index
      %151 = vector.load %arg7[%c0_49, %c0_50] : memref<8x32xf32, #tpu.memory_space<vmem>>, vector<8x32xf32>
      tpu.vector_store %arg7[%c0_49, %c0_50], %150 {strides = array<i32>} : memref<8x32xf32, #tpu.memory_space<vmem>>, vector<8x32xf32>,
    } else {
    }
    %c0 = arith.constant 0 : index
    %c0_1 = arith.constant 0 : index
    %3 = vector.load %arg7[%c0, %c0_1] : memref<8x32xf32, #tpu.memory_space<vmem>>, vector<8x32xf32>
    %c0_2 = arith.constant 0 : index
    %c0_3 = arith.constant 0 : index
    %c0_4 = arith.constant 0 : index
    %4 = vector.load %arg2[%c0_2, %c0_3, %c0_4] : memref<1x32x96xf32, #tpu.memory_space<vmem>>, vector<1x32x96xf32>
    %5 = vector.shape_cast %4 : vector<1x32x96xf32> to vector<32x96xf32>
    %c0_5 = arith.constant 0 : index
    %c0_6 = arith.constant 0 : index
    %c0_7 = arith.constant 0 : index
    %6 = vector.load %arg3[%c0_5, %c0_6, %c0_7] : memref<1x32x96xf32, #tpu.memory_space<vmem>>, vector<1x32x96xf32>
    %7 = vector.shape_cast %6 : vector<1x32x96xf32> to vector<32x96xf32>
    %8 = vector.extract_strided_slice %7 {offsets = [0, 0], sizes = [32, 32], strides = [1, 1]} : vector<32x96xf32> to vector<32x32xf32>
    %9 = vector.extract_strided_slice %7 {offsets = [0, 32], sizes = [32, 64], strides = [1, 1]} : vector<32x96xf32> to vector<32x64xf32>
    %c0_8 = arith.constant 0 : index
    %c0_9 = arith.constant 0 : index
    %c0_10 = arith.constant 0 : index
    %10 = vector.load %arg4[%c0_8, %c0_9, %c0_10] : memref<1x64x32xf32, #tpu.memory_space<vmem>>, vector<1x64x32xf32>
    %11 = vector.shape_cast %10 : vector<1x64x32xf32> to vector<64x32xf32>
    %c0_11 = arith.constant 0 : index
    %c0_12 = arith.constant 0 : index
    %c0_13 = arith.constant 0 : index
    %12 = vector.load %arg5[%c0_11, %c0_12, %c0_13] : memref<1x8x96xf32, #tpu.memory_space<vmem>>, vector<1x8x96xf32>
    %13 = vector.shape_cast %12 : vector<1x8x96xf32> to vector<8x96xf32>
    %14 = vector.extract_strided_slice %13 {offsets = [0, 0], sizes = [1, 96], strides = [1, 1]} : vector<8x96xf32> to vector<1x96xf32>
    %15 = vector.extract_strided_slice %13 {offsets = [1, 0], sizes = [1, 32], strides = [1, 1]} : vector<8x96xf32> to vector<1x32xf32>
    %16 = vector.extract_strided_slice %13 {offsets = [2, 0], sizes = [1, 64], strides = [1, 1]} : vector<8x96xf32> to vector<1x64xf32>
    %17 = vector.extract_strided_slice %13 {offsets = [3, 0], sizes = [1, 32], strides = [1, 1]} : vector<8x96xf32> to vector<1x32xf32>
    %18 = vector.extract_strided_slice %13 {offsets = [4, 0], sizes = [1, 32], strides = [1, 1]} : vector<8x96xf32> to vector<1x32xf32>
    %19 = vector.extract_strided_slice %13 {offsets = [5, 0], sizes = [1, 32], strides = [1, 1]} : vector<8x96xf32> to vector<1x32xf32>
    %20 = vector.extract_strided_slice %13 {offsets = [6, 0], sizes = [1, 32], strides = [1, 1]} : vector<8x96xf32> to vector<1x32xf32>
    %21 = vector.extract_strided_slice %13 {offsets = [7, 0], sizes = [1, 32], strides = [1, 1]} : vector<8x96xf32> to vector<1x32xf32>
    %cst = arith.constant dense<0.000000e+00> : vector<8xf32>
    %22 = vector.multi_reduction <add>, %3, %cst [1] : vector<8x32xf32> to vector<8xf32>
    %23 = vector.shape_cast %22 : vector<8xf32> to vector<8x1xf32>
    %cst_14 = arith.constant 3.200000e+01 : f32
    %24 = vector.broadcast %cst_14 : f32 to vector<8x1xf32>
    %25 = arith.divf %23, %24 : vector<8x1xf32>
    %26 = vector.broadcast %25 : vector<8x1xf32> to vector<8x32xf32>
    %27 = arith.subf %3, %26 : vector<8x32xf32>
    %28 = arith.mulf %27, %27 : vector<8x32xf32>
    %cst_15 = arith.constant dense<0.000000e+00> : vector<8xf32>
    %29 = vector.multi_reduction <add>, %28, %cst_15 [1] : vector<8x32xf32> to vector<8xf32>
    %30 = vector.shape_cast %29 : vector<8xf32> to vector<8x1xf32>
    %cst_16 = arith.constant 3.200000e+01 : f32
    %31 = vector.broadcast %cst_16 : f32 to vector<8x1xf32>
    %32 = arith.divf %30, %31 : vector<8x1xf32>
    %33 = vector.broadcast %25 : vector<8x1xf32> to vector<8x32xf32>
    %34 = arith.subf %3, %33 : vector<8x32xf32>
    %cst_17 = arith.constant 9.99999974E-6 : f32
    %35 = vector.broadcast %cst_17 : f32 to vector<8x1xf32>
    %36 = arith.addf %32, %35 : vector<8x1xf32>
    %37 = math.rsqrt %36 : vector<8x1xf32>
    %38 = vector.broadcast %37 : vector<8x1xf32> to vector<8x32xf32>
    %39 = arith.mulf %34, %38 : vector<8x32xf32>
    %40 = vector.broadcast %18 : vector<1x32xf32> to vector<8x32xf32>
    %41 = arith.mulf %39, %40 : vector<8x32xf32>
    %42 = vector.broadcast %19 : vector<1x32xf32> to vector<8x32xf32>
    %43 = arith.addf %41, %42 : vector<8x32xf32>
    %cst_18 = arith.constant dense<0.000000e+00> : vector<8x96xf32>
    %44 = tpu.matmul %43, %5, %cst_18 {dimension_numbers = #tpu.dot_dimension_numbers<[1], [0], [0], [1], [0, 0, 1, 1], [], []>} : vector<8x32xf32>, vector<32x96xf32>, vector<8x96xf32> -> vector<8x96xf32>
    %45 = vector.broadcast %14 : vector<1x96xf32> to vector<8x96xf32>
    %46 = arith.addf %44, %45 : vector<8x96xf32>
    %47 = vector.extract_strided_slice %46 {offsets = [0, 0], sizes = [8, 32], strides = [1, 1]} : vector<8x96xf32> to vector<8x32xf32>
    %48 = vector.extract_strided_slice %46 {offsets = [0, 32], sizes = [8, 32], strides = [1, 1]} : vector<8x96xf32> to vector<8x32xf32>
    %49 = vector.extract_strided_slice %46 {offsets = [0, 64], sizes = [8, 32], strides = [1, 1]} : vector<8x96xf32> to vector<8x32xf32>
    %50 = vector.extract_strided_slice %47 {offsets = [0, 0], sizes = [8, 8], strides = [1, 1]} : vector<8x32xf32> to vector<8x8xf32>
    %51 = vector.extract_strided_slice %48 {offsets = [0, 0], sizes = [8, 8], strides = [1, 1]} : vector<8x32xf32> to vector<8x8xf32>
    %cst_19 = arith.constant dense<0.000000e+00> : vector<8x8xf32>
    %52 = tpu.matmul %50, %51, %cst_19 {dimension_numbers = #tpu.dot_dimension_numbers<[1], [1], [0], [0], [0, 0, 1, 0], [], []>} : vector<8x8xf32>, vector<8x8xf32>, vector<8x8xf32> -> vector<8x8xf32>
    %cst_20 = arith.constant dense<0xFF800000> : vector<8xf32>
    %53 = vector.multi_reduction <maximumf>, %52, %cst_20 [1] : vector<8x8xf32> to vector<8xf32>
    %54 = vector.shape_cast %53 : vector<8xf32> to vector<8x1xf32>
    %55 = vector.broadcast %54 : vector<8x1xf32> to vector<8x8xf32>
    %56 = arith.subf %52, %55 : vector<8x8xf32>
    %57 = math.exp %56 : vector<8x8xf32>
    %cst_21 = arith.constant dense<0.000000e+00> : vector<8xf32>
    %58 = vector.multi_reduction <add>, %57, %cst_21 [1] : vector<8x8xf32> to vector<8xf32>
    %59 = vector.shape_cast %58 : vector<8xf32> to vector<8x1xf32>
    %60 = tpu.reciprocal %59 {approx = true} : vector<8x1xf32> -> vector<8x1xf32>
    %61 = vector.broadcast %60 : vector<8x1xf32> to vector<8x8xf32>
    %62 = arith.mulf %57, %61 : vector<8x8xf32>
    %63 = vector.extract_strided_slice %49 {offsets = [0, 0], sizes = [8, 8], strides = [1, 1]} : vector<8x32xf32> to vector<8x8xf32>
    %cst_22 = arith.constant dense<0.000000e+00> : vector<8x8xf32>
    %64 = tpu.matmul %62, %63, %cst_22 {dimension_numbers = #tpu.dot_dimension_numbers<[1], [0], [0], [1], [0, 0, 1, 1], [], []>} : vector<8x8xf32>, vector<8x8xf32>, vector<8x8xf32> -> vector<8x8xf32>
    %65 = vector.extract_strided_slice %47 {offsets = [0, 8], sizes = [8, 8], strides = [1, 1]} : vector<8x32xf32> to vector<8x8xf32>
    %66 = vector.extract_strided_slice %48 {offsets = [0, 8], sizes = [8, 8], strides = [1, 1]} : vector<8x32xf32> to vector<8x8xf32>
    %cst_23 = arith.constant dense<0.000000e+00> : vector<8x8xf32>
    %67 = tpu.matmul %65, %66, %cst_23 {dimension_numbers = #tpu.dot_dimension_numbers<[1], [1], [0], [0], [0, 0, 1, 0], [], []>} : vector<8x8xf32>, vector<8x8xf32>, vector<8x8xf32> -> vector<8x8xf32>
    %cst_24 = arith.constant dense<0xFF800000> : vector<8xf32>
    %68 = vector.multi_reduction <maximumf>, %67, %cst_24 [1] : vector<8x8xf32> to vector<8xf32>
    %69 = vector.shape_cast %68 : vector<8xf32> to vector<8x1xf32>
    %70 = vector.broadcast %69 : vector<8x1xf32> to vector<8x8xf32>
    %71 = arith.subf %67, %70 : vector<8x8xf32>
    %72 = math.exp %71 : vector<8x8xf32>
    %cst_25 = arith.constant dense<0.000000e+00> : vector<8xf32>
    %73 = vector.multi_reduction <add>, %72, %cst_25 [1] : vector<8x8xf32> to vector<8xf32>
    %74 = vector.shape_cast %73 : vector<8xf32> to vector<8x1xf32>
    %75 = tpu.reciprocal %74 {approx = true} : vector<8x1xf32> -> vector<8x1xf32>
    %76 = vector.broadcast %75 : vector<8x1xf32> to vector<8x8xf32>
    %77 = arith.mulf %72, %76 : vector<8x8xf32>
    %78 = vector.extract_strided_slice %49 {offsets = [0, 8], sizes = [8, 8], strides = [1, 1]} : vector<8x32xf32> to vector<8x8xf32>
    %cst_26 = arith.constant dense<0.000000e+00> : vector<8x8xf32>
    %79 = tpu.matmul %77, %78, %cst_26 {dimension_numbers = #tpu.dot_dimension_numbers<[1], [0], [0], [1], [0, 0, 1, 1], [], []>} : vector<8x8xf32>, vector<8x8xf32>, vector<8x8xf32> -> vector<8x8xf32>
    %80 = vector.extract_strided_slice %47 {offsets = [0, 16], sizes = [8, 8], strides = [1, 1]} : vector<8x32xf32> to vector<8x8xf32>
    %81 = vector.extract_strided_slice %48 {offsets = [0, 16], sizes = [8, 8], strides = [1, 1]} : vector<8x32xf32> to vector<8x8xf32>
    %cst_27 = arith.constant dense<0.000000e+00> : vector<8x8xf32>
    %82 = tpu.matmul %80, %81, %cst_27 {dimension_numbers = #tpu.dot_dimension_numbers<[1], [1], [0], [0], [0, 0, 1, 0], [], []>} : vector<8x8xf32>, vector<8x8xf32>, vector<8x8xf32> -> vector<8x8xf32>
    %cst_28 = arith.constant dense<0xFF800000> : vector<8xf32>
    %83 = vector.multi_reduction <maximumf>, %82, %cst_28 [1] : vector<8x8xf32> to vector<8xf32>
    %84 = vector.shape_cast %83 : vector<8xf32> to vector<8x1xf32>
    %85 = vector.broadcast %84 : vector<8x1xf32> to vector<8x8xf32>
    %86 = arith.subf %82, %85 : vector<8x8xf32>
    %87 = math.exp %86 : vector<8x8xf32>
    %cst_29 = arith.constant dense<0.000000e+00> : vector<8xf32>
    %88 = vector.multi_reduction <add>, %87, %cst_29 [1] : vector<8x8xf32> to vector<8xf32>
    %89 = vector.shape_cast %88 : vector<8xf32> to vector<8x1xf32>
    %90 = tpu.reciprocal %89 {approx = true} : vector<8x1xf32> -> vector<8x1xf32>
    %91 = vector.broadcast %90 : vector<8x1xf32> to vector<8x8xf32>
    %92 = arith.mulf %87, %91 : vector<8x8xf32>
    %93 = vector.extract_strided_slice %49 {offsets = [0, 16], sizes = [8, 8], strides = [1, 1]} : vector<8x32xf32> to vector<8x8xf32>
    %cst_30 = arith.constant dense<0.000000e+00> : vector<8x8xf32>
    %94 = tpu.matmul %92, %93, %cst_30 {dimension_numbers = #tpu.dot_dimension_numbers<[1], [0], [0], [1], [0, 0, 1, 1], [], []>} : vector<8x8xf32>, vector<8x8xf32>, vector<8x8xf32> -> vector<8x8xf32>
    %95 = vector.extract_strided_slice %47 {offsets = [0, 24], sizes = [8, 8], strides = [1, 1]} : vector<8x32xf32> to vector<8x8xf32>
    %96 = vector.extract_strided_slice %48 {offsets = [0, 24], sizes = [8, 8], strides = [1, 1]} : vector<8x32xf32> to vector<8x8xf32>
    %cst_31 = arith.constant dense<0.000000e+00> : vector<8x8xf32>
    %97 = tpu.matmul %95, %96, %cst_31 {dimension_numbers = #tpu.dot_dimension_numbers<[1], [1], [0], [0], [0, 0, 1, 0], [], []>} : vector<8x8xf32>, vector<8x8xf32>, vector<8x8xf32> -> vector<8x8xf32>
    %cst_32 = arith.constant dense<0xFF800000> : vector<8xf32>
    %98 = vector.multi_reduction <maximumf>, %97, %cst_32 [1] : vector<8x8xf32> to vector<8xf32>
    %99 = vector.shape_cast %98 : vector<8xf32> to vector<8x1xf32>
    %100 = vector.broadcast %99 : vector<8x1xf32> to vector<8x8xf32>
    %101 = arith.subf %97, %100 : vector<8x8xf32>
    %102 = math.exp %101 : vector<8x8xf32>
    %cst_33 = arith.constant dense<0.000000e+00> : vector<8xf32>
    %103 = vector.multi_reduction <add>, %102, %cst_33 [1] : vector<8x8xf32> to vector<8xf32>
    %104 = vector.shape_cast %103 : vector<8xf32> to vector<8x1xf32>
    %105 = tpu.reciprocal %104 {approx = true} : vector<8x1xf32> -> vector<8x1xf32>
    %106 = vector.broadcast %105 : vector<8x1xf32> to vector<8x8xf32>
    %107 = arith.mulf %102, %106 : vector<8x8xf32>
    %108 = vector.extract_strided_slice %49 {offsets = [0, 24], sizes = [8, 8], strides = [1, 1]} : vector<8x32xf32> to vector<8x8xf32>
    %cst_34 = arith.constant dense<0.000000e+00> : vector<8x8xf32>
    %109 = tpu.matmul %107, %108, %cst_34 {dimension_numbers = #tpu.dot_dimension_numbers<[1], [0], [0], [1], [0, 0, 1, 1], [], []>} : vector<8x8xf32>, vector<8x8xf32>, vector<8x8xf32> -> vector<8x8xf32>
    %110 = tpu.concatenate %64, %79, %94, %109 in 1 : vector<8x8xf32>, vector<8x8xf32>, vector<8x8xf32>, vector<8x8xf32> -> vector<8x32xf32>
    %cst_35 = arith.constant dense<0.000000e+00> : vector<8x32xf32>
    %111 = tpu.matmul %110, %8, %cst_35 {dimension_numbers = #tpu.dot_dimension_numbers<[1], [0], [0], [1], [0, 0, 1, 1], [], []>} : vector<8x32xf32>, vector<32x32xf32>, vector<8x32xf32> -> vector<8x32xf32>
    %112 = vector.broadcast %15 : vector<1x32xf32> to vector<8x32xf32>
    %113 = arith.addf %111, %112 : vector<8x32xf32>
    %114 = arith.addf %3, %113 : vector<8x32xf32>
    %cst_36 = arith.constant dense<0.000000e+00> : vector<8xf32>
    %115 = vector.multi_reduction <add>, %114, %cst_36 [1] : vector<8x32xf32> to vector<8xf32>
    %116 = vector.shape_cast %115 : vector<8xf32> to vector<8x1xf32>
    %cst_37 = arith.constant 3.200000e+01 : f32
    %117 = vector.broadcast %cst_37 : f32 to vector<8x1xf32>
    %118 = arith.divf %116, %117 : vector<8x1xf32>
    %119 = vector.broadcast %118 : vector<8x1xf32> to vector<8x32xf32>
    %120 = arith.subf %114, %119 : vector<8x32xf32>
    %121 = arith.mulf %120, %120 : vector<8x32xf32>
    %cst_38 = arith.constant dense<0.000000e+00> : vector<8xf32>
    %122 = vector.multi_reduction <add>, %121, %cst_38 [1] : vector<8x32xf32> to vector<8xf32>
    %123 = vector.shape_cast %122 : vector<8xf32> to vector<8x1xf32>
    %cst_39 = arith.constant 3.200000e+01 : f32
    %124 = vector.broadcast %cst_39 : f32 to vector<8x1xf32>
    %125 = arith.divf %123, %124 : vector<8x1xf32>
    %126 = vector.broadcast %118 : vector<8x1xf32> to vector<8x32xf32>
    %127 = arith.subf %114, %126 : vector<8x32xf32>
    %cst_40 = arith.constant 9.99999974E-6 : f32
    %128 = vector.broadcast %cst_40 : f32 to vector<8x1xf32>
    %129 = arith.addf %125, %128 : vector<8x1xf32>
    %130 = math.rsqrt %129 : vector<8x1xf32>
    %131 = vector.broadcast %130 : vector<8x1xf32> to vector<8x32xf32>
    %132 = arith.mulf %127, %131 : vector<8x32xf32>
    %133 = vector.broadcast %20 : vector<1x32xf32> to vector<8x32xf32>
    %134 = arith.mulf %132, %133 : vector<8x32xf32>
    %135 = vector.broadcast %21 : vector<1x32xf32> to vector<8x32xf32>
    %136 = arith.addf %134, %135 : vector<8x32xf32>
    %cst_41 = arith.constant dense<0.000000e+00> : vector<8x64xf32>
    %137 = tpu.matmul %136, %9, %cst_41 {dimension_numbers = #tpu.dot_dimension_numbers<[1], [0], [0], [1], [0, 0, 1, 1], [], []>} : vector<8x32xf32>, vector<32x64xf32>, vector<8x64xf32> -> vector<8x64xf32>
    %138 = vector.broadcast %16 : vector<1x64xf32> to vector<8x64xf32>
    %139 = arith.addf %137, %138 : vector<8x64xf32>
    %cst_42 = arith.constant 0.000000e+00 : f32
    %140 = vector.broadcast %cst_42 : f32 to vector<8x64xf32>
    %141 = arith.maximumf %139, %140 : vector<8x64xf32>
    %cst_43 = arith.constant dense<0.000000e+00> : vector<8x32xf32>
    %142 = tpu.matmul %141, %11, %cst_43 {dimension_numbers = #tpu.dot_dimension_numbers<[1], [0], [0], [1], [0, 0, 1, 1], [], []>} : vector<8x64xf32>, vector<64x32xf32>, vector<8x32xf32> -> vector<8x32xf32>
    %143 = vector.broadcast %17 : vector<1x32xf32> to vector<8x32xf32>
    %144 = arith.addf %142, %143 : vector<8x32xf32>
    %145 = arith.addf %114, %144 : vector<8x32xf32>
    %c0_44 = arith.constant 0 : index
    %c0_45 = arith.constant 0 : index
    %146 = vector.load %arg7[%c0_44, %c0_45] : memref<8x32xf32, #tpu.memory_space<vmem>>, vector<8x32xf32>
    tpu.vector_store %arg7[%c0_44, %c0_45], %145 {strides = array<i32>} : memref<8x32xf32, #tpu.memory_space<vmem>>, vector<8x32xf32>,
    %c1_i32 = arith.constant 1 : i32
    %147 = arith.cmpi eq, %arg0, %c1_i32 : i32
    %148 = arith.extui %147 : i1 to i32
    %c0_i32_46 = arith.constant 0 : i32
    %149 = arith.cmpi ne, %148, %c0_i32_46 : i32
    scf.if %149 {
      %c0_47 = arith.constant 0 : index
      %c0_48 = arith.constant 0 : index
      %150 = vector.load %arg6[%c0_47, %c0_48] : memref<8x32xf32, #tpu.memory_space<vmem>>, vector<8x32xf32>
      tpu.vector_store %arg6[%c0_47, %c0_48], %145 {strides = array<i32>} : memref<8x32xf32, #tpu.memory_space<vmem>>, vector<8x32xf32>,
    } else {
    }
    return
  }
  func.func @transform_0(%arg0: i32) -> (i32, i32) {
    %c0_i32 = arith.constant 0 : i32
    %c0_i32_0 = arith.constant 0 : i32
    %c0_i32_1 = arith.constant 0 : i32
    return %c0_i32, %c0_i32_0 : i32, i32
  }
  func.func @transform_1(%arg0: i32) -> (i32, i32, i32) {
    %c0_i32 = arith.constant 0 : i32
    %c0_i32_0 = arith.constant 0 : i32
    %c0_i32_1 = arith.constant 0 : i32
    return %arg0, %c0_i32, %c0_i32_0 : i32, i32, i32
  }
  func.func @transform_2(%arg0: i32) -> (i32, i32, i32) {
    %c0_i32 = arith.constant 0 : i32
    %c0_i32_0 = arith.constant 0 : i32
    %c0_i32_1 = arith.constant 0 : i32
    return %arg0, %c0_i32, %c0_i32_0 : i32, i32, i32
  }
  func.func @transform_3(%arg0: i32) -> (i32, i32, i32) {
    %c0_i32 = arith.constant 0 : i32
    %c0_i32_0 = arith.constant 0 : i32
    %c0_i32_1 = arith.constant 0 : i32
    return %arg0, %c0_i32, %c0_i32_0 : i32, i32, i32
  }
  func.func @transform_4(%arg0: i32) -> (i32, i32, i32) {
    %c0_i32 = arith.constant 0 : i32
    %c0_i32_0 = arith.constant 0 : i32
    %c0_i32_1 = arith.constant 0 : i32
    return %arg0, %c0_i32, %c0_i32_0 : i32, i32, i32
  }
  func.func @transform_5(%arg0: i32) -> (i32, i32) {
    %c0_i32 = arith.constant 0 : i32
    %c0_i32_0 = arith.constant 0 : i32
    %c0_i32_1 = arith.constant 0 : i32
    return %c0_i32, %c0_i32_0 : i32, i32
  }
}

</mosaic_0001>

<bundles_post_ra>
// kernel: transformer_encoder.1
= control target key start
LH: loop header
LB: loop body
LE: loop exit
PB: predicated region body
PF: predicated region fallthrough
CT: control target
= control target key end

     0   :  { %10 = vsyncpa [#allocation4], 0  ;;  %s1020_s18 = smov 0   ;;  %s1157_s0 = inlined_call_operand.vmem [shape: f32[8,32], index: 0, kind: input, shape index: {}]   ;;  %s1158_s1 = inlined_call_operand.vmem [shape: f32[2,32,96], index: 1, kind: input, shape index: {}]   ;;  %s1159_s2 = inlined_call_operand.vmem [shape: f32[2,32,96], index: 2, kind: input, shape index: {}]   ;;  %s1160_s3 = inlined_call_operand.vmem [shape: f32[2,64,32], index: 3, kind: input, shape index: {}]   ;;  %s1161_s4 = inlined_call_operand.vmem [shape: f32[2,8,96], index: 4, kind: input, shape index: {}]   ;;  %s1162_s5 = inlined_call_operand.hbm [shape: f32[8,32], index: 5, kind: output, shape index: {}]  }
   0x1 LB: > { %s1026_s19 = sadd.s32 4294967295, %s972_s18   ;;  %p839_p0 = scmp.ge.s32.totalorder %s972_s18, 1  ;;  %s972_s18 = sphi %s1020_s18, %s16_s18  }
   0x2   : > { %p212_p1 = scmp.lt.s32.totalorder %s972_s18, 3 }
   0x4   : > { %p213_p2 = pnand %p839_p0, %p212_p1 }
   0x5   : > { %p249_p3 = scmp.lt.s32.totalorder (!%p213_p2), %s1026_s19, 1  ;;  %p847_p4 = scmp.ne.s32.totalorder (!%p213_p2), %s1026_s19, 0 }
   0x6   : > { %216 = sbr.rel (%p213_p2) target bundleno = 2252 (0x8cc), region = 40 }
   0xb   : > { %s250_s20 = scalar_select %p249_p3, %s1026_s19, 1 }
   0xc   : > { %271 = sbr.rel (%p847_p4) target bundleno = 19 (0x13), region = 44 }
   0xd   : > { %s869_s21 = sshll.u32 %s250_s20, 5  ;;  %s871_s22 = sshll.u32 %s250_s20, 6 }
   0xe   : > { %s1035_s25 = scalar_lea.vmem %s1158_s1, %s869_s21  ;;  %s1040_s28 = scalar_lea.vmem %s1159_s2, %s869_s21 }
   0xf   : > { %s1045_s6 = scalar_lea.vmem %s1160_s3, %s871_s22  ;;  %s846_s7 = sshll.u32 %s250_s20, 3 }
  0x10   : > { %s1050_s10 = scalar_lea.vmem %s1161_s4, %s846_s7 }
  0x11   : > { %v272_v0 = vld [vmem:[%s1157_s0] sm:$0xff]  ;;  %vm273_vm0 = vcmask 261120  }
  0x12   : > { %274 = vst.msk [vmem:[#allocation2] sm:$0xff] %vm273_vm0, %v272_v0 }
  0x13 PF: > { %vm293_vm1 = vcmask 261120   ;;  %v974_v3 = vmov 32.0   ;;  %v279_v15 = vld [vmem:[%s1035_s25 + $0x18] sm:$0xff]  ;;  %v278_v16 = vld [vmem:[%s1035_s25 + $0x10] sm:$0xff]  ;;  %v277_v17 = vld [vmem:[%s1035_s25 + $0x8] sm:$0xff]  ;;  %s975_s13 = smov 64  }
  0x14   : > { %912 = vrcp.f32 %v974_v3  ;;  %343 = vmatpush.msra.mxu0 %v279_v15  ;;  %v276_v18 = vld [vmem:[%s1035_s25] sm:$0xff]  ;;  %s976_s14 = smov 120   ;;  %s977_s15 = smov 96   ;;  %vm354_vm6 = vcmask 64512   ;;  %vm624_vm7 = vcmask 130048   ;;  %vm626_vm8 = vcmask 195584  }
  0x15   : > { %v1071_v27 = vld [vmem:[%s1050_s10] sm:$0xff]  ;;  %s978_s16 = smov 72   ;;  %s979_s17 = smov 88   ;;  %vm721_vm12 = vcmask 523264  }
  0x16   : > { %344 = vmatpush.msra.mxu0 %v278_v16  ;;  %v323_v29 = vperm.slane %v1071_v27, 4  ;;  %v325_v32 = vperm.slane %v1071_v27, 5  ;;  %v327_v35 = vperm.slane %v1071_v27, 0  ;;  %s980_s20 = smov 56   ;;  %s981_s21 = smov 80  }
  0x17   : > { %s982_s22 = smov 104   ;;  %s983_s23 = smov 112  }
  0x18   : > { %345 = vmatpush.msra.mxu0 %v277_v17  ;;  %s984_s24 = smov 48   ;;  %s985_s25 = smov 8  }
  0x19   : > { %v1056_v1 = vld [vmem:[#allocation2] sm:$0xff]  ;;  %s986_s26 = smov 40   ;;  %s987_s27 = smov 16  }
  0x1a   : > { %v294_v2 = vsel %vm293_vm1, %v1056_v1, 0.0  ;;  %v913_v4 = vpop.eup %912  ;;  %346 = vmatpush.msra.mxu0 %v276_v18  ;;  %s988_s29 = smov 24   ;;  %p864_p5 = scmp.ne.s32.totalorder %s1026_s19, 1 }
  0x1b   : > { %295 = vadd.xlane.f32.xlu0 %v294_v2  ;;  %v298_v5 = vmul.f32 32.0, %v913_v4  ;;  %vm302_vm2 = vweird.f32 %v913_v4 }
  0x1d   : > { %v299_v6 = vsub.f32 1.0, %v298_v5 }
  0x1f   : > { %v300_v7 = vmul.f32 %v913_v4, %v299_v6 }
  0x21   : > { %v301_v8 = vadd.f32 %v913_v4, %v300_v7 }
  0x23   : > { %v1060_v9 = vsel %vm302_vm2, %v913_v4, %v301_v8 }
  0x8e   : > { %v296_v10 = vpop.xlane.xlu0 %295 }
  0x8f   : > { %v304_v11 = vmul.f32 %v1060_v9, %v296_v10 }
  0x91   : > { %v305_v12 = vsub.f32 %v1056_v1, %v304_v11 }
  0x93   : > { %v306_v13 = vmul.f32 %v305_v12, %v305_v12 }
  0x95   : > { %v307_v14 = vsel %vm293_vm1, %v306_v13, 0.0 }
  0x96   : > { %308 = vadd.xlane.f32.xlu0 %v307_v14 }
 0x109   : > { %v309_v19 = vpop.xlane.xlu0 %308 }
 0x10a   : > { %v310_v20 = vmul.f32 %v309_v19, %v1060_v9 }
 0x10c   : > { %v311_v21 = vadd.f32 1e-05, %v310_v20 }
 0x10e   : > { %914 = vrsqrt.f32 %v311_v21  ;;  %vm318_vm4 = vweird.f32 %v311_v21 }
 0x114   : > { %v915_v22 = vpop.eup %914 }
 0x115   : > { %v313_v23 = vmul.f32 %v915_v22, %v311_v21  ;;  %vm319_vm3 = vweird.f32 %v915_v22 }
 0x116   : > { %vm320_vm5 = vmor %vm318_vm4, %vm319_vm3 }
 0x117   : > { %v314_v24 = vmul.f32 %v915_v22, %v313_v23 }
 0x119   : > { %v315_v25 = vmul.f32 0.5, %v314_v24 }
 0x11b   : > { %v316_v26 = vsub.f32 1.5, %v315_v25 }
 0x11d   : > { %v317_v28 = vmul.f32 %v915_v22, %v316_v26 }
 0x11f   : > { %v321_v30 = vsel %vm320_vm5, %v915_v22, %v317_v28 }
 0x120   : > { %v322_v31 = vmul.f32 %v321_v30, %v305_v12 }
 0x122   : > { %v324_v33 = vmul.f32 %v323_v29, %v322_v31 }
 0x124   : > { %v326_v34 = vadd.f32 %v325_v32, %v324_v33  ;;  %v283_v32 = vld [vmem:[%s1040_s28 + $0x18] sm:$0xff]  ;;  %v282_v33 = vld [vmem:[%s1040_s28 + $0x10] sm:$0xff] }
 0x126   : > { %848 = vmatmul.msk.f32.vlgmr.msra.gmra.mxu0 %vm293_vm1, %v326_v34  ;;  %v902_v34 = vpack.i.bf16 %v282_v33, %v283_v32 }
 0x1a3   : > { %v348_v36 = vpop.f32.mrf.mxu0 }
 0x1a4   : > { %v1077_v37 = vadd.f32 %v348_v36, %v327_v35  ;;  %v281_v35 = vld [vmem:[%s1040_s28 + $0x8] sm:$0xff]  ;;  %v280_v36 = vld [vmem:[%s1040_s28] sm:$0xff] }
 0x1a6   : > { %390 = vrot.lane.b32.xlu0 %v1077_v37, %s975_s13  ;;  %416 = vrot.lane.b32.xlu2 %v1077_v37, %s976_s14 }
 0x1a7   : > { %352 = vrot.lane.b32.xlu1 %v1077_v37, %s977_s15 }
 0x1ae   : > { %548 = vrot.lane.b32.xlu0 %v1077_v37, %s978_s16 }
 0x1af   : > { %418 = vrot.lane.b32.xlu1 %v1077_v37, %s979_s17 }
 0x200   : > { %v417_v41 = vpop.permute.xlu2 %416 }
 0x218   : > { %v391_v38 = vpop.permute.xlu0 %390 }
 0x219   : > { %v353_v39 = vpop.permute.xlu1 %352  ;;  %411 = vmatpush.msra.mxu2 %v391_v38 }
 0x21a   : > { %849 = vmatpush.xpose.msk.msra.mxu1 %vm354_vm6, %v353_v39 }
 0x21d   : > { %850 = vmatmul.msk.f32.vlgmr.msra.gmra.mxu1 %vm354_vm6, %v1077_v37 }
 0x220   : > { %v549_v49 = vpop.permute.xlu0 %548 }
 0x221   : > { %v419_v40 = vpop.permute.xlu1 %418 }
 0x222   : > { %852 = vmatpush.xpose.msk.msra.mxu3 %vm354_vm6, %v419_v40 }
 0x225   : > { %853 = vmatmul.msk.f32.vlgmr.msra.gmra.mxu3 %vm354_vm6, %v417_v41 }
 0x29a   : > { %v376_v42 = vpop.f32.mrf.mxu1 }
 0x29b   : > { %v379_v43 = vsel %vm354_vm6, %v376_v42, -inf }
 0x29c   : > { %380 = vmax.xlane.f32.xlu2 %v379_v43 }
 0x2a8   : > { %v441_v44 = vpop.f32.mrf.mxu3 }
 0x2a9   : > { %v444_v45 = vsel %vm354_vm6, %v441_v44, -inf }
 0x2aa   : > { %445 = vmax.xlane.f32.xlu0 %v444_v45 }
 0x2b4   : > { %455 = vrot.lane.b32.xlu2 %v1077_v37, %s980_s20 }
 0x2be   : > { %483 = vrot.lane.b32.xlu0 %v1077_v37, %s981_s21 }
 0x30f   : > { %v381_v46 = vpop.xlane.xlu2 %380 }
 0x310   : > { %v382_v47 = vsub.f32 %v376_v42, %v381_v46 }
 0x312   : > { %v383_v48 = vmul.f32 1.442695, %v382_v47 }
 0x314   : > { %916 = vpow2.f32 %v383_v48 }
 0x317   : > { %v456_v50 = vpop.permute.xlu2 %455 }
 0x318   : > { %476 = vmatpush.msrb.mxu2 %v456_v50 }
 0x31a   : > { %v917_v51 = vpop.eup %916 }
 0x31b   : > { %v385_v52 = vsel %vm354_vm6, %v917_v51, 0.0 }
 0x31c   : > { %386 = vadd.xlane.f32.xlu1 %v385_v52 }
 0x31d   : > { %v446_v53 = vpop.xlane.xlu0 %445 }
 0x31e   : > { %v447_v54 = vsub.f32 %v441_v44, %v446_v53  ;;  %v628_v44 = vperm.slane %v1071_v27, 1 }
 0x320   : > { %v448_v55 = vmul.f32 1.442695, %v447_v54 }
 0x322   : > { %918 = vpow2.f32 %v448_v55 }
 0x328   : > { %v919_v56 = vpop.eup %918 }
 0x329   : > { %v450_v57 = vsel %vm354_vm6, %v919_v56, 0.0 }
 0x32a   : > { %451 = vadd.xlane.f32.xlu0 %v450_v57 }
 0x330   : > { %v484_v58 = vpop.permute.xlu0 %483 }
 0x331   : > { %855 = vmatpush.xpose.msk.msrb.mxu1 %vm354_vm6, %v484_v58 }
 0x335   : > { %546 = vrot.lane.b32.xlu1 %v1077_v37, %s982_s22  ;;  %644 = vmatpush.msra.mxu1 %v283_v32 }
 0x337   : > { %645 = vmatpush.msra.mxu1 %v282_v33 }
 0x339   : > { %646 = vmatpush.msra.mxu1 %v281_v35 }
 0x33b   : > { %647 = vmatpush.msra.mxu1 %v280_v36 }
 0x33e   : > { %481 = vrot.lane.b32.xlu0 %v1077_v37, %s983_s23 }
 0x38f   : > { %v387_v59 = vpop.xlane.xlu1 %386 }
 0x390   : > { %920 = vrcp.f32 %v387_v59  ;;  %v291_v59 = vld [vmem:[%s1045_s6 + $0x38] sm:$0xff] }
 0x391   : > { %733 = vmatpush.msrb.mxu0 %v291_v59 }
 0x396   : > { %v921_v60 = vpop.eup %920 }
 0x397   : > { %v389_v61 = vmul.f32 %v921_v60, %v917_v51  ;;  %v290_v60 = vld [vmem:[%s1045_s6 + $0x30] sm:$0xff] }
 0x398   : > { %734 = vmatpush.msrb.mxu0 %v290_v60 }
 0x399   : > { %851 = vmatmul.msk.f32.vlgmr.msra.gmra.mxu2 %vm354_vm6, %v389_v61  ;;  %v289_v61 = vld [vmem:[%s1045_s6 + $0x28] sm:$0xff] }
 0x39a   : > { %858 = vmatpush.xpose.msk.msra.mxu2 %vm354_vm6, %v549_v49  ;;  %735 = vmatpush.msrb.mxu0 %v289_v61 }
 0x39d   : > { %v452_v62 = vpop.xlane.xlu0 %451 }
 0x39e   : > { %922 = vrcp.f32 %v452_v62 }
 0x3a4   : > { %v923_v63 = vpop.eup %922 }
 0x3a5   : > { %v454_v0 = vmul.f32 %v923_v63, %v919_v56 }
 0x3a7   : > { %854 = vmatmul.msk.f32.vlgmr.msrb.gmra.mxu2 %vm354_vm6, %v454_v0  ;;  %v547_v2 = vpop.permute.xlu1 %546  ;;  %v288_v0 = vld [vmem:[%s1045_s6 + $0x20] sm:$0xff] }
 0x3a8   : > { %736 = vmatpush.msrb.mxu0 %v288_v0 }
 0x3af   : > { %859 = vmatmul.msk.f32.vlgmr.msra.gmra.mxu2 %vm354_vm6, %v547_v2 }
 0x3b0   : > { %v482_v3 = vpop.permute.xlu0 %481 }
 0x3b1   : > { %856 = vmatmul.msk.f32.vlgmr.msrb.gmra.mxu1 %vm354_vm6, %v482_v3  ;;  %v287_v3 = vld [vmem:[%s1045_s6 + $0x18] sm:$0xff] }
 0x3b2   : > { %737 = vmatpush.msrb.mxu0 %v287_v3 }
 0x41c   : > { %v1104_v4 = vpop.f32.mrf.mxu2 }
 0x42a   : > { %v478_v5 = vpop.f32.mrf.mxu2 }
 0x42e   : > { %v506_v6 = vpop.f32.mrf.mxu1 }
 0x42f   : > { %v509_v7 = vsel %vm354_vm6, %v506_v6, -inf }
 0x430   : > { %510 = vmax.xlane.f32.xlu2 %v509_v7 }
 0x432   : > { %v571_v8 = vpop.f32.mrf.mxu2 }
 0x433   : > { %v574_v10 = vsel %vm354_vm6, %v571_v8, -inf }
 0x434   : > { %575 = vmax.xlane.f32.xlu0 %v574_v10 }
 0x448   : > { %520 = vrot.lane.b32.xlu0 %v1077_v37, %s984_s24 }
 0x4a3   : > { %v511_v11 = vpop.xlane.xlu2 %510 }
 0x4a4   : > { %v512_v12 = vsub.f32 %v506_v6, %v511_v11 }
 0x4a6   : > { %v513_v13 = vmul.f32 1.442695, %v512_v12 }
 0x4a7   : > { %v576_v14 = vpop.xlane.xlu0 %575 }
 0x4a8   : > { %924 = vpow2.f32 %v513_v13  ;;  %v577_v15 = vsub.f32 %v571_v8, %v576_v14  ;;  %v677_v13 = vperm.slane %v1071_v27, 7 }
 0x4aa   : > { %v578_v16 = vmul.f32 1.442695, %v577_v15 }
 0x4ac   : > { %926 = vpow2.f32 %v578_v16  ;;  %v286_v16 = vld [vmem:[%s1045_s6 + $0x10] sm:$0xff] }
 0x4ad   : > { %738 = vmatpush.msrb.mxu0 %v286_v16 }
 0x4ae   : > { %v925_v17 = vpop.eup %924 }
 0x4af   : > { %v515_v18 = vsel %vm354_vm6, %v925_v17, 0.0 }
 0x4b0   : > { %516 = vadd.xlane.f32.xlu1 %v515_v18  ;;  %v284_v18 = vld [vmem:[%s1045_s6] sm:$0xff] }
 0x4b2   : > { %v927_v19 = vpop.eup %926 }
 0x4b3   : > { %v580_v20 = vsel %vm354_vm6, %v927_v19, 0.0 }
 0x4b4   : > { %581 = vadd.xlane.f32.xlu2 %v580_v20 }
 0x4ba   : > { %v521_v21 = vpop.permute.xlu0 %520 }
 0x4bb   : > { %541 = vmatpush.msrb.mxu3 %v521_v21 }
 0x4c9   : > { %612 = vrot.lane.b32.xlu1 %v478_v5, %s985_s25 }
 0x4cc   : > { %585 = vrot.lane.b32.xlu2 %v1077_v37, %s986_s26  ;;  %v907_v37 = vpack.i.bf16 %v280_v36, %v281_v35 }
 0x523   : > { %v517_v22 = vpop.xlane.xlu1 %516 }
 0x524   : > { %928 = vrcp.f32 %v517_v22 }
 0x527   : > { %v582_v23 = vpop.xlane.xlu2 %581 }
 0x528   : > { %930 = vrcp.f32 %v582_v23  ;;  %v720_v23 = vperm.slane %v1071_v27, 3 }
 0x52a   : > { %v929_v24 = vpop.eup %928 }
 0x52b   : > { %v519_v25 = vmul.f32 %v929_v24, %v925_v17  ;;  %v285_v17 = vld [vmem:[%s1045_s6 + $0x8] sm:$0xff] }
 0x52c   : > { %739 = vmatpush.msrb.mxu0 %v285_v17 }
 0x52d   : > { %857 = vmatmul.msk.f32.vlgmr.msrb.gmra.mxu3 %vm354_vm6, %v519_v25 }
 0x52e   : > { %v931_v26 = vpop.eup %930  ;;  %740 = vmatpush.msrb.mxu0 %v284_v18 }
 0x52f   : > { %v584_v28 = vmul.f32 %v931_v26, %v927_v19  ;;  %v586_v29 = vpop.permute.xlu2 %585  ;;  %v679_v19 = vperm.slane %v1071_v27, 2 }
 0x530   : > { %606 = vmatpush.msrb.mxu2 %v586_v29 }
 0x531   : > { %860 = vmatmul.msk.f32.vlgmr.msrb.gmra.mxu2 %vm354_vm6, %v584_v28 }
 0x53b   : > { %v613_v39 = vpop.permute.xlu1 %612 }
 0x53c   : > { %v623_v40 = vsel %vm354_vm6, %v1104_v4, %v613_v39 }
 0x5b0   : > { %v543_v30 = vpop.f32.mrf.mxu3 }
 0x5b1   : > { %616 = vrot.lane.b32.xlu0 %v543_v30, %s987_s27 }
 0x5b4   : > { %v608_v31 = vpop.f32.mrf.mxu2 }
 0x5b9   : > { %620 = vrot.lane.b32.xlu0 %v608_v31, %s988_s29 }
 0x5c1   : > { %903 = vrot.lane.b32.xlu0 %v902_v34, %s977_s15 }
 0x5c9   : > { %908 = vrot.lane.b32.xlu0 %v907_v37, %s977_s15 }
 0x623   : > { %v617_v38 = vpop.permute.xlu0 %616 }
 0x624   : > { %v625_v41 = vsel %vm624_vm7, %v623_v40, %v617_v38 }
 0x62b   : > { %v621_v42 = vpop.permute.xlu0 %620 }
 0x62c   : > { %v627_v43 = vsel %vm626_vm8, %v625_v41, %v621_v42 }
 0x62d   : > { %861 = vmatmul.msk.f32.vlgmr.msra.gmra.mxu1 %vm293_vm1, %v627_v43 }
 0x633   : > { %v904_v54 = vpop.permute.xlu0 %903 }
 0x634   : > { %v905_v55 = vunpack.i.l.bf16 %v904_v54 }
 0x636   : > { %711 = vmatpush.msra.mxu3 %v905_v55 }
 0x63b   : > { %v909_v56 = vpop.permute.xlu0 %908 }
 0x63c   : > { %v910_v57 = vunpack.i.l.bf16 %v909_v56  ;;  %v911_v58 = vunpack.i.h.bf16 %v909_v56 }
 0x6aa   : > { %v649_v45 = vpop.f32.mrf.mxu1 }
 0x6ab   : > { %v650_v46 = vadd.f32 %v649_v45, %v628_v44 }
 0x6ad   : > { %v1125_v47 = vadd.f32 %v650_v46, %v1056_v1  ;;  %v906_v1 = vunpack.i.h.bf16 %v904_v54 }
 0x6af   : > { %v653_v48 = vsel %vm293_vm1, %v1125_v47, 0.0  ;;  %712 = vmatpush.msra.mxu3 %v906_v1 }
 0x6b0   : > { %654 = vadd.xlane.f32.xlu2 %v653_v48 }
 0x6b1   : > { %713 = vmatpush.msra.mxu3 %v910_v57 }
 0x6b3   : > { %714 = vmatpush.msra.mxu3 %v911_v58 }
 0x723   : > { %v655_v49 = vpop.xlane.xlu2 %654 }
 0x724   : > { %v656_v50 = vmul.f32 %v655_v49, %v1060_v9 }
 0x726   : > { %v657_v51 = vsub.f32 %v1125_v47, %v656_v50 }
 0x728   : > { %v658_v52 = vmul.f32 %v657_v51, %v657_v51 }
 0x72a   : > { %v659_v53 = vsel %vm293_vm1, %v658_v52, 0.0 }
 0x72b   : > { %660 = vadd.xlane.f32.xlu1 %v659_v53 }
 0x79e   : > { %v661_v62 = vpop.xlane.xlu1 %660 }
 0x79f   : > { %v662_v63 = vmul.f32 %v661_v62, %v1060_v9  ;;  %v675_v9 = vperm.slane %v1071_v27, 6 }
 0x7a1   : > { %v663_v2 = vadd.f32 1e-05, %v662_v63 }
 0x7a3   : > { %932 = vrsqrt.f32 %v663_v2  ;;  %vm670_vm10 = vweird.f32 %v663_v2 }
 0x7a9   : > { %v933_v4 = vpop.eup %932 }
 0x7aa   : > { %v665_v5 = vmul.f32 %v933_v4, %v663_v2  ;;  %vm671_vm9 = vweird.f32 %v933_v4 }
 0x7ab   : > { %vm672_vm11 = vmor %vm670_vm10, %vm671_vm9 }
 0x7ac   : > { %v666_v6 = vmul.f32 %v933_v4, %v665_v5 }
 0x7ae   : > { %v667_v7 = vmul.f32 0.5, %v666_v6 }
 0x7b0   : > { %v668_v8 = vsub.f32 1.5, %v667_v7 }
 0x7b2   : > { %v669_v10 = vmul.f32 %v933_v4, %v668_v8 }
 0x7b4   : > { %v673_v11 = vsel %vm672_vm11, %v933_v4, %v669_v10 }
 0x7b5   : > { %v674_v12 = vmul.f32 %v673_v11, %v657_v51 }
 0x7b7   : > { %v676_v14 = vmul.f32 %v675_v9, %v674_v12 }
 0x7b9   : > { %v678_v15 = vadd.f32 %v677_v13, %v676_v14 }
 0x7bb   : > { %862 = vmatmul.msk.f32.vlgmr.msra.gmra.mxu3 %vm293_vm1, %v678_v15 }
 0x83e   : > { %v716_v20 = vpop.f32.mrf.mxu3 }
 0x83f   : > { %v717_v21 = vadd.f32 %v716_v20, %v679_v19 }
 0x841   : > { %v719_v22 = vmax.f32 %v717_v21, 0.0 }
 0x843   : > { %863 = vmatmul.msk.f32.vlgmr.msrb.gmra.mxu0 %vm721_vm12, %v719_v22 }
 0x8c0   : > { %v742_v24 = vpop.f32.mrf.mxu0 }
 0x8c1   : > { %v743_v25 = vadd.f32 %v742_v24, %v720_v23  ;;  %750 = sbr.rel (%p864_p5) target bundleno = 2247 (0x8c7), region = 48 }
 0x8c3   : > { %v745_v26 = vadd.f32 %v743_v25, %v1125_v47 }
 0x8c5   : > { %746 = vst.msk [vmem:[#allocation2] sm:$0xff] %vm293_vm1, %v745_v26 }
 0x8c6   : > { %751 = vst.msk [vmem:[#allocation3] sm:$0xff] %vm293_vm1, %v745_v26 }
 0x8c7 PF: > { %p876_p6 = scmp.eq.s32.totalorder %s1026_s19, 1  ;;  %s989_s28 = smov [#allocation3]  }
 0x8c8   : > { %s758_s30 = sshll.u32 %s989_s28, 4  ;;  %s760_s8 = sshll.u32 %s1162_s5, 4  ;;  %s759_s30 = int_to_ptr.vmem [resolvable:$true] %s758_s30  ;;  %s761_s8 = int_to_ptr.hbm [resolvable:$true] %s760_s8 }
 0x8c9   : > { %873 = dma.vmem_to_hbm [thread:$0]  (%p876_p6), %s759_s30, 128, %s761_s8, [#allocation4]  }
 0x8ca   : > { %967 = dma.done.wait (%p876_p6), [#allocation4], 128  }
 0x8cb   : > { %969 = vsyncadd (%p876_p6), [#allocation4], 4294967168 }
 0x8cc PF: > { %s16_s18 = sadd.s32 1, %s972_s18  }
 0x8cd   : > { %p13_p7 = scmp.ge.s32.totalorder %s16_s18, 4  }
 0x8cf   :  { %15 = sbr.rel (!%p13_p7) target bundleno = 1 (0x1), region = 84 }
 0x8d4   :  { %774 = vsyncpa [#allocation4], 1 }
 0x8d5   :  { %776 = vsyncpa [#allocation4 + $0x1], 1 }

</bundles_post_ra>
